<compile_context>
chip_gen: v5e
topology: v5e:2x2
jax: 0.10.0
libtpu: 0.0.40
codegen_flags: <defaults>
</compile_context>

<pallas_src>
import jax
import jax.numpy as jnp
import numpy as np
from jax.experimental import pallas as pl
from jax.experimental.pallas import tpu as pltpu

KSIZE = 5
PAD = 2
LANE = 128


# --------------------------------------------------------------------------- #
# Kernel
# --------------------------------------------------------------------------- #
def _conv1d_relu_mask_kernel(lens_ref, x_ref, w_ref, b_ref, o_ref):
    # lens_ref: SMEM (K,) int32      valid length of each diagonal
    # x_ref:    VMEM (1, 1, Bt, Lt+4) conv window (with 2-lane halo each side)
    # w_ref:    VMEM (C, KSIZE)       Conv1d weight (in_channels == 1, squeezed)
    # b_ref:    VMEM (C, 1)           Conv1d bias
    # o_ref:    VMEM (1, Bt, C, Lt)
    k = pl.program_id(0)
    j = pl.program_id(2)
    L_k = lens_ref[k]                       # scalar read from SMEM

    xw = x_ref[0, 0]                        # (Bt, Lt + 2*PAD) float32
    w = w_ref[...]                          # (C, KSIZE)
    bias = b_ref[...]                       # (C, 1)
    Lt = o_ref.shape[-1]

    # Center tap fused with the bias (saves zeros-init + one add).
    acc = (xw[:, PAD:PAD + Lt][:, None, :] * w[:, PAD][None, :, None]
           + bias[None, :, :])              # (Bt, C, Lt) f32

    # Remaining taps: static slices of the halo'd window (halo already holds the
    # conv's zero padding and the zero fill beyond each diagonal's length).
    for t in range(KSIZE):
        if t == PAD:
            continue
        acc = acc + xw[:, t:t + Lt][:, None, :] * w[:, t][None, :, None]

    # Fused ReLU + tail mask: global positions i >= L_k must be exactly zero
    # (the reference pads AFTER conv+ReLU, so ReLU(bias) there would be wrong).
    lane = jax.lax.broadcasted_iota(jnp.int32, (1, 1, Lt), 2) + j * Lt
    feat = jnp.where(lane < L_k, jnp.maximum(acc, 0.0), 0.0)
    o_ref[0] = feat.astype(o_ref.dtype)


# --------------------------------------------------------------------------- #
# Tiling / VMEM sizing helpers
# --------------------------------------------------------------------------- #
def _round_up(x, m):
    return (x + m - 1) // m * m


def _vmem_limit_bytes():
    # Chip-aware scoped-VMEM limit: ~half of physical (64 MiB on v5e/v6e's
    # 128 MiB, 32 MiB on v7x's 64 MiB).
    try:
        cap = int(pltpu.get_tpu_info().vmem_capacity_bytes)
    except Exception:
        cap = 128 << 20
    return min(64 << 20, cap // 2)


def _pick_tiles(B, C, Lp, budget_bytes):
    """Choose (Lt, Bt): length tile (multiple of 128 dividing Lp, <= 1024) and
    batch tile sized so the double-buffered blocks + in-kernel temps fit the
    budget."""
    def best_lt(limit):
        best = LANE
        for cand in range(LANE, min(Lp, limit) + 1, LANE):
            if Lp % cand == 0:
                best = cand
        return best

    def cap_for(lt):
        # Rough f32 bytes per batch row per grid step:
        # 2x input window + 2x output block + ~3x (C,Lt) accumulator/temps.
        per_row = 4 * (2 * (lt + 2 * PAD) + 5 * C * lt)
        return max(1, budget_bytes // per_row)

    Lt = best_lt(1024)
    while cap_for(Lt) < min(B, 8) and Lt > LANE:
        Lt = best_lt(Lt - LANE)

    cap = cap_for(Lt)
    if B <= cap:
        return Lt, B
    bt = (cap // 8) * 8
    if bt >= 8:
        d = bt
        while d >= 8:                 # prefer a divisor of B (no ragged edge)
            if B % d == 0:
                return Lt, d
            d -= 8
        return Lt, bt                 # ragged edge: cdiv grid, Pallas masks it
    return Lt, B                      # degenerate; vmem_limit is set explicitly


# --------------------------------------------------------------------------- #
# Wrapper
# --------------------------------------------------------------------------- #
def band_limited_encode(diagonals, weight, bias, out_dtype=None, stacked=False):
    """Pallas version of BandLimitedEncoder.forward.

    diagonals: list of (B, L_k) arrays, L_0 >= L_k (L_0 = main diagonal).
    weight:    (C, 1, KSIZE) Conv1d weight (torch layout).
    bias:      (C,) Conv1d bias.
    out_dtype: output dtype (default: input dtype); accumulation is f32.
    stacked:   if True, return a single (K, B, C, L_0) array (cheapest: no
               per-diagonal split pass). Default returns the list of
               (B, C, L_0) arrays, matching the torch module.
    """
    K = len(diagonals)
    B, L0 = diagonals[0].shape
    C = weight.shape[0]
    out_dtype = out_dtype if out_dtype is not None else diagonals[0].dtype

    Lp = _round_up(L0, LANE)                     # lane-dense output length
    vmem_limit = _vmem_limit_bytes()
    Lt, Bt = _pick_tiles(B, C, Lp, (vmem_limit * 5) // 8)
    nJ = Lp // Lt
    nB = -(-B // Bt)

    lens = jnp.asarray([d.shape[-1] for d in diagonals], jnp.int32)

    # Stack diagonals, zero-fill to Lp (this is also the conv's zero padding
    # beyond each L_k), add the 2-lane conv halo, and cut overlapping per-tile
    # windows. These are passes over the INPUT only (~1/C of output traffic).
    xs = jnp.stack(
        [jnp.pad(d.astype(jnp.float32), ((0, 0), (0, Lp - d.shape[-1])))
         for d in diagonals])                                    # (K, B, Lp)
    xp = jnp.pad(xs, ((0, 0), (0, 0), (PAD, PAD)))               # (K, B, Lp+4)
    x_win = jnp.stack(
        [xp[:, :, j * Lt: j * Lt + Lt + 2 * PAD] for j in range(nJ)],
        axis=1)                                                  # (K, nJ, B, Lt+4)

    w2 = weight.reshape(C, KSIZE).astype(jnp.float32)
    b2 = bias.reshape(C, 1).astype(jnp.float32)

    grid = (K, nB, nJ)
    out = pl.pallas_call(
        _conv1d_relu_mask_kernel,
        out_shape=jax.ShapeDtypeStruct((K, B, C, Lp), out_dtype),
        grid_spec=pltpu.PrefetchScalarGridSpec(
            num_scalar_prefetch=1,
            grid=grid,
            in_specs=[
                pl.BlockSpec((1, 1, Bt, Lt + 2 * PAD),
                             lambda k, b, j, lens_ref: (k, j, b, 0)),
                pl.BlockSpec((C, KSIZE), lambda k, b, j, lens_ref: (0, 0)),
                pl.BlockSpec((C, 1), lambda k, b, j, lens_ref: (0, 0)),
            ],
            out_specs=pl.BlockSpec((1, Bt, C, Lt),
                                   lambda k, b, j, lens_ref: (k, b, 0, j)),
        ),
        compiler_params=pltpu.CompilerParams(
            dimension_semantics=("parallel", "parallel", "parallel"),
            vmem_limit_bytes=vmem_limit),
    )(lens, x_win, w2, b2)

    # Single fused slice back to L0 (skipped entirely when L0 % 128 == 0),
    # then a leading-dim split to match the torch module's list output.
    sliced = out if Lp == L0 else out[..., :L0]
    if stacked:
        return sliced
    return [sliced[k] for k in range(K)]


# --------------------------------------------------------------------------- #
# Pure-JAX reference replicating the PyTorch semantics.
# --------------------------------------------------------------------------- #
def _reference_forward(diagonals, weight, bias):
    L0 = diagonals[0].shape[-1]
    outs = []
    for diag in diagonals:
        x = diag[:, None, :]                                   # (B, 1, L) NCW
        y = jax.lax.conv_general_dilated(
            x, weight, window_strides=(1,), padding=[(PAD, PAD)],
            dimension_numbers=("NCH", "OIH", "NCH"))
        y = jnp.maximum(y + bias[None, :, None], 0.0)
        y = jnp.pad(y, ((0, 0), (0, 0), (0, L0 - y.shape[-1])))
        outs.append(y)
    return outs


if __name__ == "__main__":
    key = jax.random.PRNGKey(0)
    N = 16                      # main diagonal length
    max_channels = 32
    B = 2
    lengths = [N, N - 4, N - 8]     # band-limited diagonals get shorter

    keys = jax.random.split(key, 2 + len(lengths))
    kw, kb = keys[0], keys[1]
    weight = 0.1 * jax.random.normal(kw, (max_channels, 1, KSIZE), jnp.float32)
    bias = 0.1 * jax.random.normal(kb, (max_channels,), jnp.float32)
    diagonals = [
        jax.random.normal(k, (B, L), jnp.float32)
        for k, L in zip(keys[2:], lengths)
    ]

    feats = band_limited_encode(diagonals, weight, bias)
    feats = jax.block_until_ready(feats)

    refs = _reference_forward(diagonals, weight, bias)
    for got, want in zip(feats, refs):
        assert got.shape == want.shape, (got.shape, want.shape)
        np.testing.assert_allclose(np.asarray(got), np.asarray(want),
                                   rtol=1e-5, atol=1e-5)

    # Stacked (zero-split) path sanity check.
    stacked = jax.block_until_ready(
        band_limited_encode(diagonals, weight, bias, stacked=True))
    np.testing.assert_allclose(np.asarray(stacked[1]), np.asarray(refs[1]),
                               rtol=1e-5, atol=1e-5)

    print("KERNEL_OK")
</pallas_src>

<mosaic_0001>
module attributes {stable_mosaic.version = 11 : i64} {
  func.func @_conv1d_relu_mask_kernel(%arg0: i32, %arg1: i32, %arg2: i32, %arg3: memref<3xi32, #tpu.memory_space<smem>>, %arg4: memref<1x1x2x132xf32, #tpu.memory_space<vmem>>, %arg5: memref<32x5xf32, #tpu.memory_space<vmem>>, %arg6: memref<32x1xf32, #tpu.memory_space<vmem>>, %arg7: memref<1x2x32x128xf32, #tpu.memory_space<vmem>>) attributes {dimension_semantics = [#tpu.dimension_semantics<parallel>, #tpu.dimension_semantics<parallel>, #tpu.dimension_semantics<parallel>], iteration_bounds = array<i64: 3, 1, 1>, scalar_prefetch = 1 : i64, scratch_operands = 0 : i64, tpu.core_type = #tpu.core_type<tc>, window_params = [{transform_indices = @transform_0, window_bounds = array<i64: 1, 1, 2, 132>}, {pipeline_mode = #tpu.pipeline_mode<synchronous>, transform_indices = @transform_1, window_bounds = array<i64: 32, 5>}, {pipeline_mode = #tpu.pipeline_mode<synchronous>, transform_indices = @transform_2, window_bounds = array<i64: 32, 1>}, {transform_indices = @transform_3, window_bounds = array<i64: 1, 2, 32, 128>}]} {
    %0 = arith.index_cast %arg0 : i32 to index
    %1 = memref.load %arg3[%0] : memref<3xi32, #tpu.memory_space<smem>>
    %c0 = arith.constant 0 : index
    %c0_0 = arith.constant 0 : index
    %c0_1 = arith.constant 0 : index
    %c0_2 = arith.constant 0 : index
    %2 = vector.load %arg4[%c0, %c0_0, %c0_1, %c0_2] : memref<1x1x2x132xf32, #tpu.memory_space<vmem>>, vector<1x1x2x132xf32>
    %3 = vector.shape_cast %2 : vector<1x1x2x132xf32> to vector<2x132xf32>
    %c0_3 = arith.constant 0 : index
    %c0_4 = arith.constant 0 : index
    %4 = vector.load %arg5[%c0_3, %c0_4] : memref<32x5xf32, #tpu.memory_space<vmem>>, vector<32x5xf32>
    %c0_5 = arith.constant 0 : index
    %c0_6 = arith.constant 0 : index
    %5 = vector.load %arg6[%c0_5, %c0_6] : memref<32x1xf32, #tpu.memory_space<vmem>>, vector<32x1xf32>
    %6 = vector.extract_strided_slice %3 {offsets = [0, 2], sizes = [2, 128], strides = [1, 1]} : vector<2x132xf32> to vector<2x128xf32>
    %7 = vector.shape_cast %6 : vector<2x128xf32> to vector<2x1x128xf32>
    %8 = vector.extract_strided_slice %4 {offsets = [0, 2], sizes = [32, 1], strides = [1, 1]} : vector<32x5xf32> to vector<32x1xf32>
    %9 = vector.shape_cast %8 : vector<32x1xf32> to vector<32xf32>
    %10 = vector.shape_cast %9 : vector<32xf32> to vector<1x32x1xf32>
    %11 = vector.broadcast %7 : vector<2x1x128xf32> to vector<2x32x128xf32>
    %12 = vector.broadcast %10 : vector<1x32x1xf32> to vector<2x32x128xf32>
    %13 = arith.mulf %11, %12 : vector<2x32x128xf32>
    %14 = vector.shape_cast %5 : vector<32x1xf32> to vector<1x32x1xf32>
    %15 = vector.broadcast %14 : vector<1x32x1xf32> to vector<2x32x128xf32>
    %16 = arith.addf %13, %15 : vector<2x32x128xf32>
    %17 = vector.extract_strided_slice %3 {offsets = [0, 0], sizes = [2, 128], strides = [1, 1]} : vector<2x132xf32> to vector<2x128xf32>
    %18 = vector.shape_cast %17 : vector<2x128xf32> to vector<2x1x128xf32>
    %19 = vector.extract_strided_slice %4 {offsets = [0, 0], sizes = [32, 1], strides = [1, 1]} : vector<32x5xf32> to vector<32x1xf32>
    %20 = vector.shape_cast %19 : vector<32x1xf32> to vector<32xf32>
    %21 = vector.shape_cast %20 : vector<32xf32> to vector<1x32x1xf32>
    %22 = vector.broadcast %18 : vector<2x1x128xf32> to vector<2x32x128xf32>
    %23 = vector.broadcast %21 : vector<1x32x1xf32> to vector<2x32x128xf32>
    %24 = arith.mulf %22, %23 : vector<2x32x128xf32>
    %25 = arith.addf %16, %24 : vector<2x32x128xf32>
    %26 = vector.extract_strided_slice %3 {offsets = [0, 1], sizes = [2, 128], strides = [1, 1]} : vector<2x132xf32> to vector<2x128xf32>
    %27 = vector.shape_cast %26 : vector<2x128xf32> to vector<2x1x128xf32>
    %28 = vector.extract_strided_slice %4 {offsets = [0, 1], sizes = [32, 1], strides = [1, 1]} : vector<32x5xf32> to vector<32x1xf32>
    %29 = vector.shape_cast %28 : vector<32x1xf32> to vector<32xf32>
    %30 = vector.shape_cast %29 : vector<32xf32> to vector<1x32x1xf32>
    %31 = vector.broadcast %27 : vector<2x1x128xf32> to vector<2x32x128xf32>
    %32 = vector.broadcast %30 : vector<1x32x1xf32> to vector<2x32x128xf32>
    %33 = arith.mulf %31, %32 : vector<2x32x128xf32>
    %34 = arith.addf %25, %33 : vector<2x32x128xf32>
    %35 = vector.extract_strided_slice %3 {offsets = [0, 3], sizes = [2, 128], strides = [1, 1]} : vector<2x132xf32> to vector<2x128xf32>
    %36 = vector.shape_cast %35 : vector<2x128xf32> to vector<2x1x128xf32>
    %37 = vector.extract_strided_slice %4 {offsets = [0, 3], sizes = [32, 1], strides = [1, 1]} : vector<32x5xf32> to vector<32x1xf32>
    %38 = vector.shape_cast %37 : vector<32x1xf32> to vector<32xf32>
    %39 = vector.shape_cast %38 : vector<32xf32> to vector<1x32x1xf32>
    %40 = vector.broadcast %36 : vector<2x1x128xf32> to vector<2x32x128xf32>
    %41 = vector.broadcast %39 : vector<1x32x1xf32> to vector<2x32x128xf32>
    %42 = arith.mulf %40, %41 : vector<2x32x128xf32>
    %43 = arith.addf %34, %42 : vector<2x32x128xf32>
    %44 = vector.extract_strided_slice %3 {offsets = [0, 4], sizes = [2, 128], strides = [1, 1]} : vector<2x132xf32> to vector<2x128xf32>
    %45 = vector.shape_cast %44 : vector<2x128xf32> to vector<2x1x128xf32>
    %46 = vector.extract_strided_slice %4 {offsets = [0, 4], sizes = [32, 1], strides = [1, 1]} : vector<32x5xf32> to vector<32x1xf32>
    %47 = vector.shape_cast %46 : vector<32x1xf32> to vector<32xf32>
    %48 = vector.shape_cast %47 : vector<32xf32> to vector<1x32x1xf32>
    %49 = vector.broadcast %45 : vector<2x1x128xf32> to vector<2x32x128xf32>
    %50 = vector.broadcast %48 : vector<1x32x1xf32> to vector<2x32x128xf32>
    %51 = arith.mulf %49, %50 : vector<2x32x128xf32>
    %52 = arith.addf %43, %51 : vector<2x32x128xf32>
    %53 = tpu.iota {dimensions = array<i32: 2>} : vector<1x1x128xi32>
    %c128_i32 = arith.constant 128 : i32
    %54 = arith.muli %arg2, %c128_i32 : i32
    %55 = vector.broadcast %54 : i32 to vector<1x1x128xi32>
    %56 = arith.addi %53, %55 : vector<1x1x128xi32>
    %57 = vector.broadcast %1 : i32 to vector<1x1x128xi32>
    %58 = arith.cmpi slt, %56, %57 : vector<1x1x128xi32>
    %cst = arith.constant 0.000000e+00 : f32
    %59 = vector.broadcast %cst : f32 to vector<2x32x128xf32>
    %60 = arith.maximumf %52, %59 : vector<2x32x128xf32>
    %cst_7 = arith.constant 0.000000e+00 : f32
    %61 = vector.shape_cast %58 : vector<1x1x128xi1> to vector<1x1x128xi1>
    %62 = vector.broadcast %61 : vector<1x1x128xi1> to vector<2x32x128xi1>
    %63 = vector.broadcast %cst_7 : f32 to vector<2x32x128xf32>
    %64 = arith.select %62, %60, %63 : vector<2x32x128xi1>, vector<2x32x128xf32>
    %c0_8 = arith.constant 0 : index
    %c0_9 = arith.constant 0 : index
    %c0_10 = arith.constant 0 : index
    %c0_11 = arith.constant 0 : index
    %65 = vector.load %arg7[%c0_8, %c0_9, %c0_10, %c0_11] : memref<1x2x32x128xf32, #tpu.memory_space<vmem>>, vector<1x2x32x128xf32>
    %66 = vector.shape_cast %65 : vector<1x2x32x128xf32> to vector<2x32x128xf32>
    %67 = vector.shape_cast %64 : vector<2x32x128xf32> to vector<1x2x32x128xf32>
    tpu.vector_store %arg7[%c0_8, %c0_9, %c0_10, %c0_11], %67 {strides = array<i32>} : memref<1x2x32x128xf32, #tpu.memory_space<vmem>>, vector<1x2x32x128xf32>,
    return
  }
  func.func @transform_0(%arg0: i32, %arg1: i32, %arg2: i32, %arg3: memref<3xi32, #tpu.memory_space<smem>>) -> (i32, i32, i32, i32) {
    %c0_i32 = arith.constant 0 : i32
    %c0_i32_0 = arith.constant 0 : i32
    return %arg0, %arg2, %arg1, %c0_i32 : i32, i32, i32, i32
  }
  func.func @transform_1(%arg0: i32, %arg1: i32, %arg2: i32, %arg3: memref<3xi32, #tpu.memory_space<smem>>) -> (i32, i32) {
    %c0_i32 = arith.constant 0 : i32
    %c0_i32_0 = arith.constant 0 : i32
    %c0_i32_1 = arith.constant 0 : i32
    return %c0_i32, %c0_i32_0 : i32, i32
  }
  func.func @transform_2(%arg0: i32, %arg1: i32, %arg2: i32, %arg3: memref<3xi32, #tpu.memory_space<smem>>) -> (i32, i32) {
    %c0_i32 = arith.constant 0 : i32
    %c0_i32_0 = arith.constant 0 : i32
    %c0_i32_1 = arith.constant 0 : i32
    return %c0_i32, %c0_i32_0 : i32, i32
  }
  func.func @transform_3(%arg0: i32, %arg1: i32, %arg2: i32, %arg3: memref<3xi32, #tpu.memory_space<smem>>) -> (i32, i32, i32, i32) {
    %c0_i32 = arith.constant 0 : i32
    %c0_i32_0 = arith.constant 0 : i32
    return %arg0, %arg1, %c0_i32, %arg2 : i32, i32, i32, i32
  }
}

</mosaic_0001>

<bundles_post_ra>
// kernel: tpu_custom_call.1
= control target key start
LH: loop header
LB: loop body
LE: loop exit
PB: predicated region body
PF: predicated region fallthrough
CT: control target
= control target key end

     0   :  { %s1179_s18 = smov [#allocation3]   ;;  %s1736_s0 = inlined_call_operand.vmem [shape: s32[3], index: 0, kind: input, shape index: {}]   ;;  %s1737_s1 = inlined_call_operand.vmem [shape: f32[3,1,2,132], index: 1, kind: input, shape index: {}]   ;;  %s1738_s2 = inlined_call_operand.vmem [shape: f32[32,5], index: 2, kind: input, shape index: {}]   ;;  %s1739_s3 = inlined_call_operand.vmem [shape: f32[32,1], index: 3, kind: input, shape index: {}]   ;;  %s1740_s4 = inlined_call_operand.hbm [shape: f32[3,2,32,128], index: 4, kind: output, shape index: {}]  }
   0x1   :  { %s10_s17 = sshll.u32 %s1736_s0, 4  ;;  %s11_s17 = int_to_ptr.vmem [resolvable:$true] %s10_s17 }
   0x2   :  { %13 = dma.vmem_to_smem %s11_s17, 16, %s1179_s18, [#allocation2] }
   0x3   :  { %1149 = dma.done.wait [#allocation2], 16 }
   0x4   :  { %1150 = vsyncadd [#allocation2], 4294967280 }
   0x5   :  { %16 = sfence }
   0x6   :  { %17 = vsyncpa [#allocation5], 0 }
   0x7   :  { %19 = vsyncpa [#allocation5 + $0x1], 0  ;;  %s1219_s19 = smov 0   ;;  %s1221_s20 = smov 0  }
   0x8   :  { %s1223_s21 = smov 0   ;;  %s1225_s22 = smov 0  }
   0x9   :  { %s1227_s23 = smov 0   ;;  %s1229_s24 = smov 0  }
   0xa LB: > { %s989_s0 = sadd.s32 4294967295, %s1177_s24   ;;  %s990_s25 = sadd.s32 4294967294, %s1177_s24   ;;  %s1177_s24 = sphi %s1229_s24, %s25_s24   ;;  %s1173_s23 = sphi %s1227_s23, %s1749_s23   ;;  %s1169_s22 = sphi %s1225_s22, %s1748_s22   ;;  %s1165_s21 = sphi %s1223_s21, %s1747_s21   ;;  %s1161_s20 = sphi %s1221_s20, %s1746_s20   ;;  %s1157_s19 = sphi %s1219_s19, %s1745_s19  }
   0xb   : > { %s44_s26 = sadd.s32 1, %s1173_s23  ;;  %s127_s27 = sadd.s32 1, %s1165_s21 }
   0xc   : > { %p46_p0 = scmp.ge.s32.totalorder %s44_s26, 3  ;;  %p137_p1 = scmp.ne.s32.totalorder %s1165_s21, %s1161_s20 }
   0xd   : > { %p138_p2 = scmp.eq.s32.totalorder %s989_s0, 2  ;;  %p143_p3 = scmp.ne.s32.totalorder %s1161_s20, %s1157_s19 }
   0xe   : > { %s1751_s26 = smov (%p46_p0, %s44_s26), 0  ;;  %p144_p5 = scmp.eq.s32.totalorder %s990_s25, 2 }
   0xf   : > { %p1259_p4 = por %p138_p2, %p137_p1  ;;  %s120_s29 = ssub.s32 %s1173_s23, %s1751_s26 }
  0x10   : > { %p993_p6 = scmp.ge.s32.totalorder %s1177_s24, 1  ;;  %p125_p7 = scmp.eq.s32.totalorder %s120_s29, 0 }
  0x11   : > { %p1266_p8 = por %p144_p5, %p143_p3  ;;  %p184_p9 = scmp.lt.s32.totalorder %s1177_s24, 4 }
  0x12   : > { %s1272_s5 = scalar_select %p125_p7, %s1165_s21, %s127_s27  }
  0x13   : > { %p185_p10 = pnand %p993_p6, %p184_p9 }
  0x14   : > { %p216_p11 = scmp.lt.s32.totalorder (!%p185_p10), %s1169_s22, 2  ;;  %s1183_s10 = smov (!%p185_p10), 2  }
  0x15   : > { %188 = sbr.rel (%p185_p10) target bundleno = 768 (0x300), region = 32  ;;  %s1184_s11 = smov (!%p185_p10), 1  }
  0x16   : > { %s1187_s12 = smov (!%p185_p10), 127   ;;  %s1188_s13 = smov (!%p185_p10), 126  }
  0x17   : > { %s230_s14 = sld [smem:[#allocation3 + %s1169_s22]] (!%p185_p10)  ;;  %s213_s15 = sand.u32 (!%p185_p10), 1, %s1161_s20  }
  0x18   : > { %s994_s16 = sshll.u32 (!%p185_p10), %s213_s15, 6  ;;  %s1003_s18 = sshll.u32 (!%p185_p10), %s1169_s22, 6 }
  0x19   : > { %s1666_s17 = scalar_lea.vmem (!%p185_p10), [#allocation4], %s994_s16  ;;  %s893_s27 = scalar_lea.hbm (!%p185_p10), %s1740_s4, %s1003_s18 }
  0x1a   : > { %v236_v0 = vld [vmem:[%s1739_s3] sm:$0xff]  ;;  %v1280_v1 = vld [vmem:[%s1738_s2 + $0x10] sm:$0xff]  ;;  %v1180_v3 = vmov 0   ;;  %v1181_v4 = vmov 2   ;;  %v237_v5 = vld [vmem:[%s1739_s3 + $0x8] sm:$0xff]  ;;  %v1182_v10 = vmov 1  }
  0x1b   : > { %v1285_v2 = vld [vmem:[%s1738_s2] sm:$0xff]  ;;  %1073 = vset.pattern.permute.xlu2 %v1180_v3  ;;  %1072 = vset.pattern.permute.xlu1 %v1181_v4  ;;  %v1295_v6 = vld [vmem:[%s1738_s2 + $0x18] sm:$0xff]  ;;  %v1300_v7 = vld [vmem:[%s1738_s2 + $0x8] sm:$0xff]  ;;  %s217_s29 = scalar_select %p216_p11, %s1169_s22, 2  ;;  %vm244_vm0 = vcmask 1040384   ;;  %vm246_vm1 = vcmask 1042434  }
  0x1c   : > { %1071 = vset.pattern.permute.xlu0 %v1181_v4  ;;  %303 = vperm.xlu2 %1073, %v236_v0   ;;  %v239_v8 = vld [vmem:[%s1739_s3 + $0x18] sm:$0xff]  ;;  %v238_v9 = vld [vmem:[%s1739_s3 + $0x10] sm:$0xff]  ;;  %vm248_vm2 = vcmask 1041408   ;;  %vm250_vm3 = vcmask 1041409   ;;  %vm252_vm4 = vcmask 1043459   ;;  %vm254_vm5 = vcmask 1042433  }
  0x1d   : > { %277 = vperm.xlu1 %1072, %v1280_v1   ;;  %267 = vperm.xlu0 %1071, %v1285_v2   ;;  %s1002_s6 = sshll.u32 %s217_s29, 2  ;;  %vm489_vm6 = vcmask 7168   ;;  %vm610_vm7 = vcmask 1039360   ;;  %vm731_vm8 = vcmask 1031168   ;;  %s894_s29 = sshll.u32 %s1666_s17, 4  ;;  %s895_s29 = int_to_ptr.vmem [resolvable:$true] %s894_s29 }
  0x1e   : > { %s228_s9 = scalar_lea.vmem %s1737_s1, %s1002_s6  ;;  %s896_s6 = sshll.u32 %s893_s27, 4  ;;  %s897_s6 = int_to_ptr.hbm [resolvable:$true] %s896_s6 }
  0x1f   : > { %v231_v12 = vld [vmem:[%s228_s9] sm:$0xf]  ;;  %s878_s22 = scalar_lea.sflag [#allocation5], %s213_s15  ;;  %s1111_s7 = sshra.s32 %s897_s6, 4  ;;  %s1112_s7 = int_to_ptr.hbm [resolvable:$true] %s1111_s7 }
  0x20   : > { %v241_v13 = vrot.slane %v231_v12, 1  ;;  %v242_v14 = vrot.slane %v231_v12, 2  ;;  %v243_v15 = vrot.slane %v231_v12, 3  ;;  %s1113_s8 = scalar_lea.hbm %s1112_s7, 64  ;;  %p1118_p1 = scmp.lt.s32.totalorder %s1112_s7, %s1740_s4 }
  0x21   : > { %p1114_p12 = scmp.ne.s32.totalorder %s1112_s7, %s1113_s8 }
  0x22   : > { %v245_v16 = vsel %vm244_vm0, %v231_v12, %v241_v13  ;;  %v247_v17 = vsel %vm246_vm1, %v242_v14, %v243_v15  ;;  %v251_v21 = vsel %vm250_vm3, %v231_v12, %v241_v13  ;;  %v253_v22 = vsel %vm252_vm4, %v242_v14, %v243_v15 }
  0x23   : > { %v249_v19 = vsel %vm248_vm2, %v245_v16, %v247_v17  ;;  %v255_v25 = vsel %vm254_vm5, %v251_v21, %v253_v22  ;;  %v1185_v22 = vmov 3   ;;  %p1115_p13 = pnand %p1114_p12, %p1259_p4 }
  0x24   : > { %308 = vperm.xlu2 %1073, %v237_v5   ;;  %v1323_v20 = vperm.slane %v249_v19, 0  ;;  %v256_v26 = vrot.slane %v255_v25, 1  ;;  %v1327_v27 = vperm.slane %v249_v19, 1 }
  0x25   : > { %282 = vperm.xlu1 %1072, %v1295_v6   ;;  %272 = vperm.xlu0 %1071, %v1300_v7   ;;  %p1116_p0 = pneg %p1115_p13 }
  0x26   : > { %v1329_v28 = vperm.slane %v256_v26, 1  ;;  %v1331_v30 = vperm.slane %v256_v26, 0 }
  0x2c   : > { %338 = vperm.xlu2 %1073, %v1285_v2  }
  0x2d   : > { %1075 = vset.pattern.permute.xlu1 %v1180_v3  ;;  %1074 = vset.pattern.permute.xlu0 %v1180_v3 }
  0x2e   : > { %318 = vperm.xlu1 %1075, %v239_v8   ;;  %313 = vperm.xlu0 %1074, %v238_v9  }
  0x34   : > { %346 = vperm.xlu2 %1073, %v1280_v1  }
  0x36   : > { %342 = vperm.xlu1 %1075, %v1300_v7   ;;  %350 = vperm.xlu0 %1074, %v1295_v6  }
  0x3c   : > { %1078 = vset.pattern.permute.xlu2 %v1182_v10 }
  0x3d   : > { %418 = vperm.xlu2 %1078, %v1280_v1  }
  0x3e   : > { %1077 = vset.pattern.permute.xlu1 %v1182_v10  ;;  %1076 = vset.pattern.permute.xlu0 %v1182_v10 }
  0x3f   : > { %414 = vperm.xlu1 %1077, %v1300_v7   ;;  %410 = vperm.xlu0 %1076, %v1285_v2  }
  0x45   : > { %1081 = vset.pattern.permute.xlu2 %v1185_v22 }
  0x47   : > { %422 = vperm.xlu1 %1077, %v1295_v6   ;;  %1079 = vset.pattern.permute.xlu0 %v1185_v22 }
  0x4f   : > { %1080 = vset.pattern.permute.xlu1 %v1185_v22 }
  0x76   : > { %v304_v11 = vpop.permute.xlu2 %303 }
  0x7e   : > { %v309_v18 = vpop.permute.xlu2 %308 }
  0x86   : > { %v339_v23 = vpop.permute.xlu2 %338 }
  0x87   : > { %v353_v24 = vmul.f32 %v339_v23, %v1323_v20  ;;  %v357_v15 = vmul.f32 %v339_v23, %v1331_v30 }
  0x89   : > { %369 = vrot.lane.b32.xlu1 %v353_v24, %s1183_s10 }
  0x8e   : > { %v347_v29 = vpop.permute.xlu2 %346 }
  0x8f   : > { %v278_v31 = vpop.permute.xlu1 %277  ;;  %v355_v32 = vmul.f32 %v347_v29, %v1323_v20  ;;  %v268_v33 = vpop.permute.xlu0 %267  ;;  %v359_v17 = vmul.f32 %v347_v29, %v1331_v30 }
  0x90   : > { %v286_v34 = vmul.f32 %v268_v33, %v1327_v27  ;;  %v285_v35 = vmul.f32 %v268_v33, %v1323_v20  ;;  %v293_v36 = vmul.f32 %v268_v33, %v1331_v30  ;;  %v294_v37 = vmul.f32 %v268_v33, %v1329_v28 }
  0x91   : > { %373 = vrot.lane.b32.xlu0 %v355_v32, %s1183_s10  ;;  %v290_v52 = vmul.f32 %v278_v31, %v1327_v27  ;;  %v289_v53 = vmul.f32 %v278_v31, %v1323_v20  ;;  %v297_v60 = vmul.f32 %v278_v31, %v1331_v30  ;;  %v298_v61 = vmul.f32 %v278_v31, %v1329_v28 }
  0x92   : > { %v1339_v38 = vadd.f32 %v304_v11, %v286_v34  ;;  %v1341_v39 = vadd.f32 %v304_v11, %v285_v35  ;;  %v1343_v40 = vadd.f32 %v304_v11, %v293_v36  ;;  %v1345_v41 = vadd.f32 %v304_v11, %v294_v37 }
  0x97   : > { %v283_v42 = vpop.permute.xlu1 %282  ;;  %v273_v43 = vpop.permute.xlu0 %272 }
  0x98   : > { %v288_v44 = vmul.f32 %v273_v43, %v1327_v27  ;;  %v287_v45 = vmul.f32 %v273_v43, %v1323_v20  ;;  %v295_v46 = vmul.f32 %v273_v43, %v1331_v30  ;;  %v296_v47 = vmul.f32 %v273_v43, %v1329_v28  ;;  %v419_v21 = vpop.permute.xlu2 %418 }
  0x99   : > { %v299_v54 = vmul.f32 %v283_v42, %v1331_v30  ;;  %v300_v55 = vmul.f32 %v283_v42, %v1329_v28  ;;  %v292_v58 = vmul.f32 %v283_v42, %v1327_v27  ;;  %v291_v59 = vmul.f32 %v283_v42, %v1323_v20 }
  0x9a   : > { %v1351_v48 = vadd.f32 %v309_v18, %v288_v44  ;;  %v1353_v49 = vadd.f32 %v309_v18, %v287_v45  ;;  %v1355_v50 = vadd.f32 %v309_v18, %v295_v46  ;;  %v1357_v51 = vadd.f32 %v309_v18, %v296_v47 }
  0x9b   : > { %v429_v24 = vmul.f32 %v419_v21, %v1323_v20  ;;  %v430_v31 = vmul.f32 %v419_v21, %v1327_v27  ;;  %v438_v42 = vmul.f32 %v419_v21, %v1329_v28  ;;  %v437_v44 = vmul.f32 %v419_v21, %v1331_v30 }
  0xa0   : > { %v319_v56 = vpop.permute.xlu1 %318  ;;  %v314_v57 = vpop.permute.xlu0 %313 }
  0xa1   : > { %v1367_v62 = vadd.f32 %v314_v57, %v290_v52  ;;  %v1369_v63 = vadd.f32 %v314_v57, %v289_v53  ;;  %v1371_v0 = vadd.f32 %v319_v56, %v299_v54  ;;  %v1373_v3 = vadd.f32 %v319_v56, %v300_v55 }
  0xa2   : > { %v1375_v4 = vadd.f32 %v319_v56, %v292_v58  ;;  %v1377_v5 = vadd.f32 %v319_v56, %v291_v59  ;;  %v1379_v8 = vadd.f32 %v314_v57, %v297_v60  ;;  %v1381_v9 = vadd.f32 %v314_v57, %v298_v61 }
  0xa8   : > { %v343_v10 = vpop.permute.xlu1 %342  ;;  %v351_v11 = vpop.permute.xlu0 %350 }
  0xa9   : > { %v354_v12 = vmul.f32 %v343_v10, %v1323_v20  ;;  %v358_v13 = vmul.f32 %v343_v10, %v1331_v30  ;;  %v356_v14 = vmul.f32 %v351_v11, %v1323_v20  ;;  %v360_v25 = vmul.f32 %v351_v11, %v1331_v30 }
  0xab   : > { %379 = vrot.lane.b32.xlu0 %v358_v13, %s1183_s10  ;;  %371 = vrot.lane.b32.xlu2 %v354_v12, %s1183_s10 }
  0xac   : > { %375 = vrot.lane.b32.xlu1 %v356_v14, %s1183_s10 }
  0xb1   : > { %v411_v16 = vpop.permute.xlu0 %410  ;;  %v415_v19 = vpop.permute.xlu1 %414 }
  0xb2   : > { %v426_v18 = vmul.f32 %v411_v16, %v1327_v27  ;;  %v427_v23 = vmul.f32 %v415_v19, %v1323_v20  ;;  %v425_v29 = vmul.f32 %v411_v16, %v1323_v20  ;;  %v428_v33 = vmul.f32 %v415_v19, %v1327_v27 }
  0xb3   : > { %377 = vrot.lane.b32.xlu2 %v357_v15, %s1183_s10  ;;  %v433_v34 = vmul.f32 %v411_v16, %v1331_v30  ;;  %v435_v35 = vmul.f32 %v415_v19, %v1331_v30  ;;  %v436_v37 = vmul.f32 %v415_v19, %v1329_v28  ;;  %v434_v43 = vmul.f32 %v411_v16, %v1329_v28 }
  0xb4   : > { %381 = vrot.lane.b32.xlu1 %v359_v17, %s1183_s10  ;;  %459 = vrot.lane.b32.xlu0 %v426_v18, %s1184_s11 }
  0xb9   : > { %v423_v26 = vpop.permute.xlu1 %422 }
  0xba   : > { %v432_v32 = vmul.f32 %v423_v26, %v1327_v27  ;;  %v431_v36 = vmul.f32 %v423_v26, %v1323_v20  ;;  %v439_v45 = vmul.f32 %v423_v26, %v1331_v30  ;;  %v440_v46 = vmul.f32 %v423_v26, %v1329_v28 }
  0xbb   : > { %383 = vrot.lane.b32.xlu2 %v360_v25, %s1183_s10 }
  0xbc   : > { %461 = vrot.lane.b32.xlu1 %v427_v23, %s1184_s11  ;;  %465 = vrot.lane.b32.xlu0 %v429_v24, %s1184_s11 }
  0xc3   : > { %457 = vrot.lane.b32.xlu2 %v425_v29, %s1184_s11 }
  0xc4   : > { %467 = vrot.lane.b32.xlu1 %v430_v31, %s1184_s11  ;;  %471 = vrot.lane.b32.xlu0 %v432_v32, %s1184_s11 }
  0xcb   : > { %463 = vrot.lane.b32.xlu2 %v428_v33, %s1184_s11 }
  0xcc   : > { %473 = vrot.lane.b32.xlu1 %v433_v34, %s1184_s11  ;;  %477 = vrot.lane.b32.xlu0 %v435_v35, %s1184_s11 }
  0xd3   : > { %469 = vrot.lane.b32.xlu2 %v431_v36, %s1184_s11 }
  0xd4   : > { %479 = vrot.lane.b32.xlu1 %v436_v37, %s1184_s11  ;;  %483 = vrot.lane.b32.xlu0 %v438_v42, %s1184_s11 }
  0xdb   : > { %475 = vrot.lane.b32.xlu2 %v434_v43, %s1184_s11 }
  0xdc   : > { %535 = vperm.xlu1 %1080, %v1300_v7   ;;  %531 = vperm.xlu0 %1079, %v1285_v2  }
  0xe3   : > { %481 = vrot.lane.b32.xlu2 %v437_v44, %s1184_s11 }
  0xe4   : > { %485 = vrot.lane.b32.xlu1 %v439_v45, %s1184_s11 }
  0xeb   : > { %539 = vperm.xlu2 %1081, %v1280_v1  }
  0xec   : > { %543 = vperm.xlu1 %1080, %v1295_v6  }
  0xf3   : > { %487 = vrot.lane.b32.xlu2 %v440_v46, %s1184_s11  ;;  %s1117_s11 = scalar_lea.hbm %s1740_s4, 192 }
  0xf4   : > { %p1119_p2 = scmp.lt.s32.totalorder %s1117_s11, %s1113_s8 }
  0xf6   : > { %p1120_p3 = por %p1119_p2, %p1118_p1 }
  0xf8   : > { %p1121_p5 = pnand %p1120_p3, %p1116_p0 }
  0xfb   : > { %v370_v47 = vpop.permute.xlu1 %369 }
  0xfc   : > { %v393_v52 = vadd.f32 %v370_v47, %v1341_v39  ;;  %v394_v53 = vadd.f32 %v370_v47, %v1339_v38 }
 0x103   : > { %v374_v54 = vpop.permute.xlu0 %373 }
 0x104   : > { %v397_v55 = vadd.f32 %v374_v54, %v1369_v63  ;;  %v398_v56 = vadd.f32 %v374_v54, %v1367_v62  ;;  %v1186_v54 = vmov 4  }
 0x105   : > { %v372_v57 = vpop.permute.xlu2 %371  ;;  %1082 = vset.pattern.permute.xlu1 %v1186_v54  ;;  %1084 = vset.pattern.permute.xlu0 %v1186_v54 }
 0x106   : > { %v395_v58 = vadd.f32 %v372_v57, %v1353_v49  ;;  %v396_v59 = vadd.f32 %v372_v57, %v1351_v48  ;;  %1083 = vset.pattern.permute.xlu2 %v1186_v54 }
 0x10d   : > { %v378_v60 = vpop.permute.xlu2 %377 }
 0x10e   : > { %v401_v61 = vadd.f32 %v378_v60, %v1343_v40  ;;  %v402_v10 = vadd.f32 %v378_v60, %v1345_v41 }
 0x115   : > { %v384_v11 = vpop.permute.xlu2 %383 }
 0x116   : > { %v1440_v39 = vadd.f32 %v384_v11, %v1371_v0  ;;  %v1443_v38 = vadd.f32 %v384_v11, %v1373_v3 }
 0x11d   : > { %v380_v63 = vpop.permute.xlu0 %379  ;;  %v458_v12 = vpop.permute.xlu2 %457 }
 0x11e   : > { %v403_v62 = vadd.f32 %v380_v63, %v1355_v50  ;;  %v404_v49 = vadd.f32 %v380_v63, %v1357_v51  ;;  %v1447_v13 = vadd.f32 %v458_v12, %v393_v52  ;;  %v376_v48 = vpop.permute.xlu1 %375 }
 0x11f   : > { %v399_v40 = vadd.f32 %v376_v48, %v1377_v5  ;;  %v400_v41 = vadd.f32 %v376_v48, %v1375_v4 }
 0x125   : > { %v464_v14 = vpop.permute.xlu2 %463 }
 0x126   : > { %v382_v0 = vpop.permute.xlu1 %381  ;;  %v460_v15 = vpop.permute.xlu0 %459 }
 0x127   : > { %v405_v3 = vadd.f32 %v382_v0, %v1379_v8  ;;  %v406_v16 = vadd.f32 %v382_v0, %v1381_v9  ;;  %v490_v17 = vsel %vm489_vm6, %v458_v12, %v460_v15 }
 0x128   : > { %v1454_v50 = vadd.f32 %v490_v17, %v394_v53 }
 0x12d   : > { %v470_v51 = vpop.permute.xlu2 %469 }
 0x12e   : > { %v1456_v18 = vadd.f32 %v470_v51, %v399_v40  ;;  %v462_v19 = vpop.permute.xlu1 %461  ;;  %v466_v21 = vpop.permute.xlu0 %465 }
 0x12f   : > { %v491_v5 = vsel %vm489_vm6, %v462_v19, %v464_v14  ;;  %v1459_v4 = vadd.f32 %v462_v19, %v395_v58  ;;  %v1461_v22 = vadd.f32 %v466_v21, %v397_v55 }
 0x130   : > { %v1463_v23 = vadd.f32 %v491_v5, %v396_v59 }
 0x135   : > { %v476_v8 = vpop.permute.xlu2 %475 }
 0x136   : > { %v468_v24 = vpop.permute.xlu1 %467  ;;  %v472_v9 = vpop.permute.xlu0 %471 }
 0x137   : > { %v492_v25 = vsel %vm489_vm6, %v466_v21, %v468_v24  ;;  %v493_v26 = vsel %vm489_vm6, %v470_v51, %v472_v9 }
 0x138   : > { %v1467_v29 = vadd.f32 %v492_v25, %v398_v56  ;;  %v1469_v31 = vadd.f32 %v493_v26, %v400_v41 }
 0x13d   : > { %v482_v32 = vpop.permute.xlu2 %481 }
 0x13e   : > { %v1471_v33 = vadd.f32 %v482_v32, %v405_v3  ;;  %v474_v34 = vpop.permute.xlu1 %473  ;;  %v478_v35 = vpop.permute.xlu0 %477 }
 0x13f   : > { %v494_v36 = vsel %vm489_vm6, %v474_v34, %v476_v8  ;;  %v1474_v37 = vadd.f32 %v474_v34, %v401_v61  ;;  %v1476_v42 = vadd.f32 %v478_v35, %v403_v62 }
 0x140   : > { %v1478_v43 = vadd.f32 %v494_v36, %v402_v10 }
 0x145   : > { %v540_v55 = vpop.permute.xlu2 %539 }
 0x146   : > { %v480_v44 = vpop.permute.xlu1 %479  ;;  %v484_v45 = vpop.permute.xlu0 %483  ;;  %v551_v61 = vmul.f32 %v540_v55, %v1327_v27  ;;  %v550_v10 = vmul.f32 %v540_v55, %v1323_v20  ;;  %v559_v3 = vmul.f32 %v540_v55, %v1329_v28 }
 0x147   : > { %v495_v46 = vsel %vm489_vm6, %v478_v35, %v480_v44  ;;  %v496_v47 = vsel %vm489_vm6, %v482_v32, %v484_v45 }
 0x148   : > { %v1482_v52 = vadd.f32 %v495_v46, %v404_v49  ;;  %v1484_v53 = vadd.f32 %v496_v47, %v406_v16  ;;  %v558_v16 = vmul.f32 %v540_v55, %v1331_v30 }
 0x14d   : > { %v488_v11 = vpop.permute.xlu2 %487 }
 0x14e   : > { %v536_v56 = vpop.permute.xlu1 %535  ;;  %v532_v57 = vpop.permute.xlu0 %531 }
 0x14f   : > { %v548_v58 = vmul.f32 %v536_v56, %v1323_v20  ;;  %v547_v59 = vmul.f32 %v532_v57, %v1327_v27  ;;  %v546_v60 = vmul.f32 %v532_v57, %v1323_v20  ;;  %v549_v48 = vmul.f32 %v536_v56, %v1327_v27 }
 0x150   : > { %v554_v41 = vmul.f32 %v532_v57, %v1331_v30  ;;  %v555_v15 = vmul.f32 %v532_v57, %v1329_v28 }
 0x151   : > { %582 = vrot.lane.b32.xlu1 %v548_v58, %s1187_s12  ;;  %580 = vrot.lane.b32.xlu0 %v547_v59, %s1187_s12 }
 0x152   : > { %578 = vrot.lane.b32.xlu2 %v546_v60, %s1187_s12 }
 0x156   : > { %v486_v63 = vpop.permute.xlu1 %485 }
 0x157   : > { %v497_v12 = vsel %vm489_vm6, %v486_v63, %v488_v11  ;;  %v1496_v62 = vadd.f32 %v486_v63, %v1440_v39  ;;  %v557_v39 = vmul.f32 %v536_v56, %v1329_v28 }
 0x158   : > { %v1499_v49 = vadd.f32 %v497_v12, %v1443_v38  ;;  %v556_v38 = vmul.f32 %v536_v56, %v1331_v30 }
 0x159   : > { %588 = vrot.lane.b32.xlu1 %v551_v61, %s1187_s12  ;;  %586 = vrot.lane.b32.xlu0 %v550_v10, %s1187_s12 }
 0x15a   : > { %584 = vrot.lane.b32.xlu2 %v549_v48, %s1187_s12 }
 0x15e   : > { %v544_v40 = vpop.permute.xlu1 %543 }
 0x15f   : > { %v553_v14 = vmul.f32 %v544_v40, %v1327_v27  ;;  %v552_v0 = vmul.f32 %v544_v40, %v1323_v20  ;;  %v561_v17 = vmul.f32 %v544_v40, %v1329_v28  ;;  %v560_v51 = vmul.f32 %v544_v40, %v1331_v30 }
 0x161   : > { %594 = vrot.lane.b32.xlu1 %v554_v41, %s1187_s12  ;;  %592 = vrot.lane.b32.xlu0 %v553_v14, %s1187_s12 }
 0x162   : > { %590 = vrot.lane.b32.xlu2 %v552_v0, %s1187_s12 }
 0x169   : > { %600 = vrot.lane.b32.xlu1 %v557_v39, %s1187_s12  ;;  %598 = vrot.lane.b32.xlu0 %v556_v38, %s1187_s12 }
 0x16a   : > { %596 = vrot.lane.b32.xlu2 %v555_v15, %s1187_s12 }
 0x171   : > { %652 = vperm.xlu1 %1082, %v1285_v2   ;;  %604 = vrot.lane.b32.xlu0 %v559_v3, %s1187_s12 }
 0x172   : > { %602 = vrot.lane.b32.xlu2 %v558_v16, %s1187_s12 }
 0x179   : > { %664 = vperm.xlu1 %1082, %v1295_v6   ;;  %660 = vperm.xlu0 %1084, %v1280_v1  }
 0x17a   : > { %656 = vperm.xlu2 %1083, %v1300_v7  }
 0x181   : > { %608 = vrot.lane.b32.xlu1 %v561_v17, %s1187_s12 }
 0x182   : > { %606 = vrot.lane.b32.xlu2 %v560_v51, %s1187_s12 }
 0x1ac   : > { %v579_v19 = vpop.permute.xlu2 %578 }
 0x1b4   : > { %v585_v2 = vpop.permute.xlu2 %584 }
 0x1b5   : > { %v1530_v21 = vadd.f32 %v585_v2, %v1463_v23 }
 0x1bc   : > { %v591_v5 = vpop.permute.xlu2 %590 }
 0x1c3   : > { %v583_v6 = vpop.permute.xlu1 %582  ;;  %v581_v8 = vpop.permute.xlu0 %580 }
 0x1c4   : > { %v612_v1 = vsel %vm610_vm7, %v583_v6, %v585_v2  ;;  %v611_v7 = vsel %vm610_vm7, %v579_v19, %v581_v8  ;;  %v1535_v24 = vadd.f32 %v581_v8, %v1454_v50  ;;  %v597_v9 = vpop.permute.xlu2 %596 }
 0x1c5   : > { %v1538_v25 = vadd.f32 %v612_v1, %v1459_v4  ;;  %v1541_v26 = vadd.f32 %v611_v7, %v1447_v13  ;;  %v1544_v23 = vadd.f32 %v597_v9, %v1478_v43 }
 0x1cb   : > { %v589_v32 = vpop.permute.xlu1 %588  ;;  %v587_v34 = vpop.permute.xlu0 %586 }
 0x1cc   : > { %v1547_v35 = vadd.f32 %v589_v32, %v1467_v29  ;;  %v613_v36 = vsel %vm610_vm7, %v587_v34, %v589_v32  ;;  %v603_v44 = vpop.permute.xlu2 %602 }
 0x1cd   : > { %v1551_v50 = vadd.f32 %v613_v36, %v1461_v22 }
 0x1d3   : > { %v595_v45 = vpop.permute.xlu1 %594  ;;  %v593_v4 = vpop.permute.xlu0 %592 }
 0x1d4   : > { %v615_v46 = vsel %vm610_vm7, %v595_v45, %v597_v9  ;;  %v614_v13 = vsel %vm610_vm7, %v591_v5, %v593_v4  ;;  %v1556_v43 = vadd.f32 %v593_v4, %v1469_v31  ;;  %v657_v47 = vpop.permute.xlu2 %656 }
 0x1d5   : > { %v1559_v54 = vadd.f32 %v615_v46, %v1474_v37  ;;  %v1562_v29 = vadd.f32 %v614_v13, %v1456_v18  ;;  %v669_v55 = vmul.f32 %v657_v47, %v1323_v20  ;;  %v678_v14 = vmul.f32 %v657_v47, %v1329_v28 }
 0x1d6   : > { %v677_v0 = vmul.f32 %v657_v47, %v1331_v30 }
 0x1d7   : > { %703 = vrot.lane.b32.xlu1 %v669_v55, %s1188_s13 }
 0x1db   : > { %v601_v22 = vpop.permute.xlu1 %600  ;;  %v599_v56 = vpop.permute.xlu0 %598 }
 0x1dc   : > { %v1567_v57 = vadd.f32 %v601_v22, %v1482_v52  ;;  %v616_v31 = vsel %vm610_vm7, %v599_v56, %v601_v22  ;;  %v607_v15 = vpop.permute.xlu2 %606 }
 0x1dd   : > { %v1571_v58 = vadd.f32 %v616_v31, %v1476_v42  ;;  %v670_v42 = vmul.f32 %v657_v47, %v1327_v27 }
 0x1e3   : > { %v653_v37 = vpop.permute.xlu1 %652  ;;  %v605_v59 = vpop.permute.xlu0 %604 }
 0x1e4   : > { %v617_v18 = vsel %vm610_vm7, %v603_v44, %v605_v59  ;;  %v1575_v60 = vadd.f32 %v605_v59, %v1484_v53  ;;  %v668_v61 = vmul.f32 %v653_v37, %v1327_v27  ;;  %v667_v10 = vmul.f32 %v653_v37, %v1323_v20 }
 0x1e5   : > { %v1580_v11 = vadd.f32 %v617_v18, %v1471_v33  ;;  %v675_v48 = vmul.f32 %v653_v37, %v1331_v30  ;;  %v676_v41 = vmul.f32 %v653_v37, %v1329_v28 }
 0x1e6   : > { %701 = vrot.lane.b32.xlu0 %v668_v61, %s1188_s13  ;;  %699 = vrot.lane.b32.xlu2 %v667_v10, %s1188_s13 }
 0x1eb   : > { %v661_v52 = vpop.permute.xlu0 %660  ;;  %v665_v53 = vpop.permute.xlu1 %664 }
 0x1ec   : > { %v672_v63 = vmul.f32 %v661_v52, %v1327_v27  ;;  %v671_v12 = vmul.f32 %v661_v52, %v1323_v20  ;;  %v673_v33 = vmul.f32 %v665_v53, %v1323_v20  ;;  %v674_v40 = vmul.f32 %v665_v53, %v1327_v27 }
 0x1ed   : > { %v679_v20 = vmul.f32 %v661_v52, %v1331_v30  ;;  %v681_v27 = vmul.f32 %v665_v53, %v1331_v30  ;;  %v680_v39 = vmul.f32 %v661_v52, %v1329_v28  ;;  %v682_v38 = vmul.f32 %v665_v53, %v1329_v28 }
 0x1ee   : > { %705 = vrot.lane.b32.xlu2 %v670_v42, %s1188_s13  ;;  %709 = vrot.lane.b32.xlu1 %v672_v63, %s1188_s13 }
 0x1ef   : > { %707 = vrot.lane.b32.xlu0 %v671_v12, %s1188_s13 }
 0x1f3   : > { %v1610_v16 = vpop.permute.xlu1 %608 }
 0x1f4   : > { %v618_v52 = vsel %vm610_vm7, %v607_v15, %v1610_v16 }
 0x1f6   : > { %711 = vrot.lane.b32.xlu2 %v673_v33, %s1188_s13  ;;  %715 = vrot.lane.b32.xlu1 %v675_v48, %s1188_s13 }
 0x1f7   : > { %713 = vrot.lane.b32.xlu0 %v674_v40, %s1188_s13 }
 0x1fe   : > { %717 = vrot.lane.b32.xlu2 %v676_v41, %s1188_s13  ;;  %721 = vrot.lane.b32.xlu1 %v678_v14, %s1188_s13 }
 0x1ff   : > { %719 = vrot.lane.b32.xlu0 %v677_v0, %s1188_s13 }
 0x206   : > { %723 = vrot.lane.b32.xlu2 %v679_v20, %s1188_s13  ;;  %727 = vrot.lane.b32.xlu1 %v681_v27, %s1188_s13 }
 0x207   : > { %725 = vrot.lane.b32.xlu0 %v680_v39, %s1188_s13 }
 0x20e   : > { %729 = vrot.lane.b32.xlu2 %v682_v38, %s1188_s13 }
 0x240   : > { %v700_v3 = vpop.permute.xlu2 %699 }
 0x248   : > { %v706_v17 = vpop.permute.xlu2 %705 }
 0x249   : > { %v704_v51 = vpop.permute.xlu1 %703  ;;  %v759_v32 = vadd.f32 %v706_v17, %v1530_v21 }
 0x24a   : > { %v733_v30 = vsel %vm731_vm8, %v704_v51, %v706_v17 }
 0x24b   : > { %v758_v19 = vadd.f32 %v733_v30, %v1538_v25  ;;  %v782_v4 = vmax.f32 %v759_v32, 0.0 }
 0x24d   : > { %v781_v2 = vmax.f32 %v758_v19, 0.0 }
 0x24f   : > { %817 = vrot.lane.b32.xlu2 %v781_v2, %s1188_s13 }
 0x250   : > { %v712_v8 = vpop.permute.xlu2 %711 }
 0x258   : > { %v702_v5 = vpop.permute.xlu0 %701  ;;  %v718_v46 = vpop.permute.xlu2 %717 }
 0x259   : > { %v732_v6 = vsel %vm731_vm8, %v700_v3, %v702_v5  ;;  %v757_v28 = vadd.f32 %v702_v5, %v1535_v24  ;;  %v765_v61 = vadd.f32 %v718_v46, %v1544_v23  ;;  %v649_v23 = vadd.f32 %v618_v52, %v1496_v62 }
 0x25a   : > { %v756_v1 = vadd.f32 %v732_v6, %v1541_v26  ;;  %v650_v62 = vadd.f32 %v1610_v16, %v1499_v49  ;;  %v777_v3 = vstv %s230_s14 }
 0x25b   : > { %v780_v7 = vmax.f32 %v757_v28, 0.0  ;;  %v788_v63 = vmax.f32 %v765_v61, 0.0 }
 0x25c   : > { %v779_v9 = vmax.f32 %v756_v1, 0.0 }
 0x25d   : > { %815 = vrot.lane.b32.xlu1 %v780_v7, %s1188_s13 }
 0x25e   : > { %813 = vrot.lane.b32.xlu0 %v779_v9, %s1188_s13 }
 0x260   : > { %v710_v25 = vpop.permute.xlu1 %709  ;;  %v724_v59 = vpop.permute.xlu2 %723 }
 0x261   : > { %v708_v34 = vpop.permute.xlu0 %707  ;;  %v761_v36 = vadd.f32 %v710_v25, %v1547_v35 }
 0x262   : > { %v734_v44 = vsel %vm731_vm8, %v708_v34, %v710_v25 }
 0x263   : > { %v760_v45 = vadd.f32 %v734_v44, %v1551_v50  ;;  %v784_v24 = vmax.f32 %v761_v36, 0.0 }
 0x265   : > { %v783_v26 = vmax.f32 %v760_v45, 0.0  ;;  %823 = vrot.lane.b32.xlu2 %v784_v24, %s1188_s13 }
 0x266   : > { %819 = vrot.lane.b32.xlu0 %v782_v4, %s1188_s13 }
 0x267   : > { %821 = vrot.lane.b32.xlu1 %v783_v26, %s1188_s13 }
 0x268   : > { %v716_v13 = vpop.permute.xlu1 %715  ;;  %v730_v53 = vpop.permute.xlu2 %729 }
 0x269   : > { %v714_v21 = vpop.permute.xlu0 %713  ;;  %v736_v47 = vsel %vm731_vm8, %v716_v13, %v718_v46  ;;  %v771_v39 = vadd.f32 %v730_v53, %v650_v62 }
 0x26a   : > { %v735_v35 = vsel %vm731_vm8, %v712_v8, %v714_v21  ;;  %v763_v55 = vadd.f32 %v714_v21, %v1556_v43  ;;  %v764_v50 = vadd.f32 %v736_v47, %v1559_v54 }
 0x26b   : > { %v762_v22 = vadd.f32 %v735_v35, %v1562_v29  ;;  %v794_v38 = vmax.f32 %v771_v39, 0.0 }
 0x26c   : > { %v786_v56 = vmax.f32 %v763_v55, 0.0  ;;  %v787_v31 = vmax.f32 %v764_v50, 0.0 }
 0x26d   : > { %v785_v37 = vmax.f32 %v762_v22, 0.0 }
 0x26e   : > { %829 = vrot.lane.b32.xlu2 %v787_v31, %s1188_s13 }
 0x26f   : > { %827 = vrot.lane.b32.xlu1 %v786_v56, %s1188_s13  ;;  %825 = vrot.lane.b32.xlu0 %v785_v37, %s1188_s13 }
 0x270   : > { %v722_v18 = vpop.permute.xlu1 %721 }
 0x271   : > { %v720_v10 = vpop.permute.xlu0 %719  ;;  %v767_v43 = vadd.f32 %v722_v18, %v1567_v57 }
 0x272   : > { %v737_v54 = vsel %vm731_vm8, %v720_v10, %v722_v18 }
 0x273   : > { %v766_v29 = vadd.f32 %v737_v54, %v1571_v58  ;;  %v790_v42 = vmax.f32 %v767_v43, 0.0 }
 0x275   : > { %v789_v12 = vmax.f32 %v766_v29, 0.0 }
 0x276   : > { %835 = vrot.lane.b32.xlu2 %v790_v42, %s1188_s13 }
 0x277   : > { %833 = vrot.lane.b32.xlu1 %v789_v12, %s1188_s13  ;;  %831 = vrot.lane.b32.xlu0 %v788_v63, %s1188_s13 }
 0x278   : > { %v728_v57 = vpop.permute.xlu1 %727 }
 0x279   : > { %v726_v33 = vpop.permute.xlu0 %725  ;;  %v739_v58 = vsel %vm731_vm8, %v728_v57, %v730_v53 }
 0x27a   : > { %v738_v48 = vsel %vm731_vm8, %v724_v59, %v726_v33  ;;  %v769_v40 = vadd.f32 %v726_v33, %v1575_v60  ;;  %v770_v41 = vadd.f32 %v739_v58, %v649_v23  ;;  %v772_v60 = vlaneseq }
 0x27b   : > { %v768_v14 = vadd.f32 %v738_v48, %v1580_v11 }
 0x27c   : > { %v792_v0 = vmax.f32 %v769_v40, 0.0  ;;  %v793_v20 = vmax.f32 %v770_v41, 0.0  ;;  %v773_v11 = vand.u32 127, %v772_v60 }
 0x27d   : > { %v791_v27 = vmax.f32 %v768_v14, 0.0 }
 0x27e   : > { %841 = vrot.lane.b32.xlu2 %v793_v20, %s1188_s13  ;;  %vm1659_vm9 = vcmp.lt.s32.totalorder %v773_v11, %v777_v3 }
 0x27f   : > { %839 = vrot.lane.b32.xlu1 %v792_v0, %s1188_s13  ;;  %837 = vrot.lane.b32.xlu0 %v791_v27, %s1188_s13 }
 0x287   : > { %843 = vrot.lane.b32.xlu0 %v794_v38, %s1188_s13 }
 0x2a9   : > { %v818_v15 = vpop.permute.xlu2 %817 }
 0x2bf   : > { %v824_v19 = vpop.permute.xlu2 %823 }
 0x2c8   : > { %v830_v7 = vpop.permute.xlu2 %829 }
 0x2cf   : > { %v816_v17 = vpop.permute.xlu1 %815 }
 0x2d0   : > { %v814_v49 = vpop.permute.xlu0 %813  ;;  %v836_v36 = vpop.permute.xlu2 %835 }
 0x2d1   : > { %v845_v16 = vsel %vm731_vm8, %v814_v49, %v816_v17 }
 0x2d2   : > { %v861_v30 = vsel %vm1659_vm9, %v845_v16, 0.0 }
 0x2d3   : > { %869 = vst [vmem:[%s1666_s17] sm:$0xff] %v861_v30 }
 0x2d8   : > { %v820_v2 = vpop.permute.xlu0 %819  ;;  %v842_v55 = vpop.permute.xlu2 %841 }
 0x2d9   : > { %v846_v5 = vsel %vm731_vm8, %v818_v15, %v820_v2  ;;  %v822_v6 = vpop.permute.xlu1 %821 }
 0x2da   : > { %v862_v28 = vsel %vm1659_vm9, %v846_v5, 0.0  ;;  %v847_v8 = vsel %vm731_vm8, %v822_v6, %v824_v19 }
 0x2db   : > { %870 = vst [vmem:[%s1666_s17 + $0x8] sm:$0xff] %v862_v28  ;;  %v863_v1 = vsel %vm1659_vm9, %v847_v8, 0.0 }
 0x2dc   : > { %871 = vst [vmem:[%s1666_s17 + $0x10] sm:$0xff] %v863_v1 }
 0x2e1   : > { %v828_v9 = vpop.permute.xlu1 %827  ;;  %v826_v32 = vpop.permute.xlu0 %825 }
 0x2e2   : > { %v848_v25 = vsel %vm731_vm8, %v826_v32, %v828_v9 }
 0x2e3   : > { %v864_v34 = vsel %vm1659_vm9, %v848_v25, 0.0 }
 0x2e4   : > { %872 = vst [vmem:[%s1666_s17 + $0x18] sm:$0xff] %v864_v34 }
 0x2e9   : > { %v834_v44 = vpop.permute.xlu1 %833  ;;  %v832_v45 = vpop.permute.xlu0 %831 }
 0x2ea   : > { %v850_v24 = vsel %vm731_vm8, %v834_v44, %v836_v36  ;;  %v849_v4 = vsel %vm731_vm8, %v830_v7, %v832_v45 }
 0x2eb   : > { %v866_v46 = vsel %vm1659_vm9, %v850_v24, 0.0  ;;  %v865_v26 = vsel %vm1659_vm9, %v849_v4, 0.0 }
 0x2ec   : > { %874 = vst [vmem:[%s1666_s17 + $0x28] sm:$0xff] %v866_v46 }
 0x2ed   : > { %873 = vst [vmem:[%s1666_s17 + $0x20] sm:$0xff] %v865_v26 }
 0x2f1   : > { %v840_v13 = vpop.permute.xlu1 %839  ;;  %v838_v21 = vpop.permute.xlu0 %837 }
 0x2f2   : > { %v851_v47 = vsel %vm731_vm8, %v838_v21, %v840_v13 }
 0x2f3   : > { %v867_v35 = vsel %vm1659_vm9, %v851_v47, 0.0 }
 0x2f4   : > { %875 = vst [vmem:[%s1666_s17 + $0x30] sm:$0xff] %v867_v35 }
 0x2f9   : > { %v844_v50 = vpop.permute.xlu0 %843 }
 0x2fa   : > { %v852_v22 = vsel %vm731_vm8, %v842_v55, %v844_v50 }
 0x2fb   : > { %v868_v56 = vsel %vm1659_vm9, %v852_v22, 0.0 }
 0x2fc   : > { %876 = vst [vmem:[%s1666_s17 + $0x38] sm:$0xff] %v868_v56 }
 0x2fd   : > { %1124 = shalt.err (!%p1121_p5)
}
 0x2fe   : > { %s1189_s14 = smov 128   ;;  %s1190_s15 = smov 8  }
 0x2ff   : > { %1004 = dma.vmem_to_hbm [thread:$0]  (%p1259_p4), %s895_s29, 1024, %s897_s6, %s878_s22, %s1189_s14, %s1189_s14, %s1190_s15  }
 0x300 PF: > { %p1010_p6 = scmp.ge.s32.totalorder %s1177_s24, 2  ;;  %s911_s16 = sand.u32 1, %s1157_s19  }
 0x301   : > { %s912_s17 = scalar_lea.sflag [#allocation5], %s911_s16 }
 0x302   : > { %p1007_p7 = pnand %p1010_p6, %p1266_p8 }
 0x304   : > { %p1008_p9 = pneg %p1007_p7 }
 0x306   : > { %1152 = dma.done.wait (%p1008_p9), %s912_s17, 1024  }
 0x307   : > { %1154 = vsyncadd (%p1008_p9), %s912_s17, 4294966272  ;;  %s25_s24 = sadd.s32 1, %s1177_s24   ;;  %s1745_s19 = smov %s1161_s20 }
 0x308   : > { %p22_p10 = scmp.ge.s32.totalorder %s25_s24, 5   ;;  %s1746_s20 = smov %s1165_s21 }
 0x309   : > { %s1747_s21 = smov %s1272_s5  ;;  %s1748_s22 = smov %s1173_s23 }
 0x30a   : > { %s1749_s23 = smov %s1751_s26  ;;  %24 = sbr.rel (!%p22_p10) target bundleno = 10 (0xa), region = 67 }
 0x30f   :  { %918 = vsyncpa [#allocation5], 1 }
 0x310   :  { %920 = vsyncpa [#allocation5 + $0x1], 1 }

</bundles_post_ra>
